<compile_context>
chip_gen: v5e
topology: v5e:2x2
jax: 0.10.0
libtpu: 0.0.40
codegen_flags: <defaults>
</compile_context>

<pallas_src>
import numpy as np
import jax
import jax.numpy as jnp
from jax.experimental import pallas as pl
from jax.experimental.pallas import tpu as pltpu


_SMALL_PROBLEM_BYTES = 8 * 1024 * 1024     # below this: single-block kernel
_RESIDENT_VMEM_BUDGET = 24 * 1024 * 1024   # live-block budget (safe on v7x 64 MiB)
_VMEM_LIMIT_BYTES = 32 * 1024 * 1024       # scoped VMEM (v5e default is only 16 MiB)


def _round_up(x: int, m: int) -> int:
    return ((x + m - 1) // m) * m


def _choose_kn_tiles(M: int, N: int):
    """256-aligned K/N tiles capped at 1024 (amortizes per-grid-step overhead).

    The "shrink tn to get two N-tiles" heuristic is intentionally dropped: it
    only matters for single-batch-tile cases on v7x, which take the small or
    batch-resident paths anyway; on v5e/v6e it just doubles step count.
    """
    tk = min(1024, _round_up(M, 256))
    tn = min(1024, _round_up(N, 256))
    return tk, tn


def _resident_fits(B_pad: int, tk: int, tn: int, wt_itemsize: int) -> bool:
    # double-buffered x + double-buffered weight + (double-buffered) f32 output
    live = 2 * B_pad * tk * 4 + 2 * tk * tn * wt_itemsize + 2 * B_pad * tn * 4
    return live <= _RESIDENT_VMEM_BUDGET


def _cost(B: int, M: int, N: int, wt_itemsize: int) -> pl.CostEstimate:
    return pl.CostEstimate(
        flops=2 * B * M * N,
        transcendentals=0,
        bytes_accessed=B * M * 4 + M * N * wt_itemsize + B * N * 4,
    )


# ---------------------------------------------------------------------------
# Kernels
# ---------------------------------------------------------------------------
def _make_accum_kernel(k_axis: int):
    """y += x @ wt, accumulating into the resident f32 output block.

    The output block index is invariant across the last ("arbitrary") grid
    axis `k_axis`, so o_ref stays resident in VMEM across the K reduction.
    Weights may be stored in bf16; they are widened in-VMEM (activations and
    accumulation stay f32).
    """

    def kernel(x_ref, wt_ref, o_ref):
        @pl.when(pl.program_id(k_axis) == 0)
        def _():
            o_ref[...] = jnp.zeros_like(o_ref)

        o_ref[...] += jnp.dot(
            x_ref[...],
            wt_ref[...].astype(jnp.float32),
            preferred_element_type=jnp.float32,
        )

    return kernel


def _small_kernel(x_ref, wt_ref, o_ref):
    o_ref[...] = jnp.dot(
        x_ref[...],
        wt_ref[...].astype(jnp.float32),
        preferred_element_type=jnp.float32,
    )


# ---------------------------------------------------------------------------
# pallas_call wrappers
# ---------------------------------------------------------------------------
def _small_matmul(x, wt):
    """Single-block y = x @ wt; whole operands pinned in VMEM (tiny problems)."""
    B, M = x.shape
    _, N = wt.shape
    return pl.pallas_call(
        _small_kernel,
        out_shape=jax.ShapeDtypeStruct((B, N), jnp.float32),
        in_specs=[
            pl.BlockSpec(memory_space=pltpu.MemorySpace.VMEM),
            pl.BlockSpec(memory_space=pltpu.MemorySpace.VMEM),
        ],
        out_specs=pl.BlockSpec(memory_space=pltpu.MemorySpace.VMEM),
        compiler_params=pltpu.CompilerParams(vmem_limit_bytes=_VMEM_LIMIT_BYTES),
        cost_estimate=_cost(B, M, N, wt.dtype.itemsize),
    )(x, wt)


def _batch_resident_matmul(x, wt, tk, tn):
    """y = x @ wt with the full (padded) batch resident in VMEM.

    grid = (N/tn, M/tk): the weight is streamed from HBM exactly once per
    call; x / out blocks carry the whole batch (x spec ignores j, out spec
    ignores k, so the f32 output accumulates in place across the K axis).
    """
    Bp, Mp = x.shape
    Mp2, Np = wt.shape
    assert Mp == Mp2 and Mp % tk == 0 and Np % tn == 0
    grid = (Np // tn, Mp // tk)
    return pl.pallas_call(
        _make_accum_kernel(1),
        out_shape=jax.ShapeDtypeStruct((Bp, Np), jnp.float32),
        grid_spec=pltpu.PrefetchScalarGridSpec(
            num_scalar_prefetch=0,
            grid=grid,
            in_specs=[
                pl.BlockSpec((Bp, tk), lambda j, k: (0, k)),
                pl.BlockSpec((tk, tn), lambda j, k: (k, j)),
            ],
            out_specs=pl.BlockSpec((Bp, tn), lambda j, k: (0, j)),
        ),
        compiler_params=pltpu.CompilerParams(
            dimension_semantics=("parallel", "arbitrary"),
            vmem_limit_bytes=_VMEM_LIMIT_BYTES,
        ),
        cost_estimate=_cost(Bp, Mp, Np, wt.dtype.itemsize),
    )(x, wt)


def _grid3d_matmul(x, wt, tb, tk, tn):
    """Fallback 3-D tiled y = x @ wt for batches too large to keep resident."""
    Bp, Mp = x.shape
    Mp2, Np = wt.shape
    assert Mp == Mp2 and Bp % tb == 0 and Mp % tk == 0 and Np % tn == 0
    grid = (Bp // tb, Np // tn, Mp // tk)
    return pl.pallas_call(
        _make_accum_kernel(2),
        out_shape=jax.ShapeDtypeStruct((Bp, Np), jnp.float32),
        grid_spec=pltpu.PrefetchScalarGridSpec(
            num_scalar_prefetch=0,
            grid=grid,
            in_specs=[
                pl.BlockSpec((tb, tk), lambda i, j, k: (i, k)),
                pl.BlockSpec((tk, tn), lambda i, j, k: (k, j)),
            ],
            out_specs=pl.BlockSpec((tb, tn), lambda i, j, k: (i, j)),
        ),
        compiler_params=pltpu.CompilerParams(
            dimension_semantics=("parallel", "parallel", "arbitrary"),
            vmem_limit_bytes=_VMEM_LIMIT_BYTES,
        ),
        cost_estimate=_cost(Bp, Mp, Np, wt.dtype.itemsize),
    )(x, wt)


def _padded_matmul(x, wt_pad, M, tk, tn):
    """x: (B, M) unpadded f32; wt_pad: (M_pad, N_pad). Returns (B_pad, N_pad) f32."""
    B = x.shape[0]
    M_pad = wt_pad.shape[0]
    itemsize = wt_pad.dtype.itemsize

    B_res = _round_up(max(B, 1), 16)
    if _resident_fits(B_res, tk, tn, itemsize):
        xp = jnp.pad(x, ((0, B_res - B), (0, M_pad - M)))
        return _batch_resident_matmul(xp, wt_pad, tk, tn)

    tb = 512
    B_pad = _round_up(B, tb)
    xp = jnp.pad(x, ((0, B_pad - B), (0, M_pad - M)))
    return _grid3d_matmul(xp, wt_pad, tb, tk, tn)


def pinv_apply(x, wt):
    """General y = x @ wt for 2-D operands of any shape; f32 output."""
    B, M = x.shape
    M2, N = wt.shape
    assert M == M2, "weight / input dim mismatch"
    x = x.astype(jnp.float32)

    itemsize = wt.dtype.itemsize
    total = B * M * 4 + M * N * itemsize + B * N * 4
    if total <= _SMALL_PROBLEM_BYTES:
        return _small_matmul(x, wt)

    tk, tn = _choose_kn_tiles(M, N)
    M_pad, N_pad = _round_up(M, tk), _round_up(N, tn)
    if (M_pad, N_pad) != (M, N):
        wt = jnp.pad(wt, ((0, M_pad - M), (0, N_pad - N)))
    y = _padded_matmul(x, wt, M, tk, tn)
    return y[:B, :N]


# ---------------------------------------------------------------------------
# PseudoInverseStore: parameter construction (glue) + Pallas forward.
# ---------------------------------------------------------------------------
class PseudoInverseStorePallas:
    """Pallas TPU port of spyrit's PseudoInverseStore (frozen forward pass).

    H is the (M, N) measurement matrix; the stored parameter is its
    Moore-Penrose pseudoinverse (N, M), exactly like
    nn.Linear(M, N, bias=False).weight in the torch module.
    """

    def __init__(self, H, reg: float = 1e-15, weight_dtype=jnp.bfloat16):
        H = np.asarray(H, np.float64)
        H_pinv = np.linalg.pinv(H, rcond=reg)          # (N, M)
        self.N, self.M = H_pinv.shape

        # torch-layout parameter kept for inspection / reference checks.
        self.H_pinv = jnp.asarray(H_pinv, jnp.float32)

        # Hoisted transpose, contiguous (M, N).  bf16 storage (the default)
        # halves weight HBM traffic; activations stay f32 and the kernel
        # accumulates in f32, so only the stored weight loses mantissa.
        self._wt = jnp.asarray(np.ascontiguousarray(H_pinv.T), weight_dtype)
        self._wt_itemsize = self._wt.dtype.itemsize

        # Hoisted tile plan + pre-padded weight for the tiled paths.
        self._tk, self._tn = _choose_kn_tiles(self.M, self.N)
        self._M_pad = _round_up(self.M, self._tk)
        self._N_pad = _round_up(self.N, self._tn)
        if (self._M_pad, self._N_pad) != (self.M, self.N):
            self._wt_pad = jnp.pad(
                self._wt,
                ((0, self._M_pad - self.M), (0, self._N_pad - self.N)),
            )
        else:
            self._wt_pad = self._wt

    def __call__(self, x):
        # x: (*, M) -> (*, N); flatten leading dims, matmul in kernel, restore.
        lead = x.shape[:-1]
        assert x.shape[-1] == self.M, "last dim must equal M"
        x2 = jnp.reshape(jnp.asarray(x, jnp.float32), (-1, self.M))
        B = x2.shape[0]

        total = (B * self.M * 4 + self.M * self.N * self._wt_itemsize
                 + B * self.N * 4)
        if total <= _SMALL_PROBLEM_BYTES:
            y2 = _small_matmul(x2, self._wt)
        else:
            y2 = _padded_matmul(x2, self._wt_pad, self.M, self._tk, self._tn)
            y2 = y2[:B, :self.N]

        return jnp.reshape(y2, lead + (self.N,))


# ---------------------------------------------------------------------------
# Self-test
# ---------------------------------------------------------------------------
def _check(y, y_ref, tol, name):
    y = np.asarray(y)
    err = float(np.max(np.abs(y - y_ref)))
    scale = float(np.max(np.abs(y_ref))) + 1e-6
    assert err <= tol * scale, f"{name}: max_err={err} scale={scale}"


if __name__ == "__main__":
    key = jax.random.PRNGKey(0)
    k_h, k_x, k_w, k_x2 = jax.random.split(key, 4)

    # ---- Demo A: module forward, f32 weights (small single-block path).
    #      M = 128 measurements, N = 16*16 = 256 pixels, leading dims (2, 5).
    M, N = 128, 256
    H = np.asarray(jax.random.uniform(k_h, (M, N), dtype=jnp.float32))
    recon_f32 = PseudoInverseStorePallas(H, reg=1e-15, weight_dtype=jnp.float32)

    x = jax.random.normal(k_x, (2, 5, M), dtype=jnp.float32)
    y = jax.block_until_ready(recon_f32(x))
    assert y.shape == (2, 5, N)
    x_np = np.asarray(x).reshape(-1, M)
    y_ref = (x_np @ np.asarray(recon_f32.H_pinv).T).reshape(2, 5, N)
    _check(y, y_ref, 2e-2, "demo A (f32 weights)")

    # ---- Demo B: default bf16 weight storage (f32 activations + accumulation).
    recon_bf16 = PseudoInverseStorePallas(H, reg=1e-15)   # weight_dtype=bf16
    yb = jax.block_until_ready(recon_bf16(x))
    assert yb.shape == (2, 5, N)
    wt_bf16_as_f32 = np.asarray(recon_bf16._wt.astype(jnp.float32))
    yb_ref = (x_np @ wt_bf16_as_f32).reshape(2, 5, N)
    _check(yb, yb_ref, 2e-2, "demo B (bf16 weights)")

    # ---- Demo C: exercise the batch-resident and 3-D tiled kernels directly
    #      at small tile-aligned shapes with a multi-step K reduction.
    B2, M2, N2, tk2, tn2 = 16, 512, 512, 256, 256
    wt2 = 0.05 * jax.random.normal(k_w, (M2, N2), dtype=jnp.float32)
    x2 = jax.random.normal(k_x2, (B2, M2), dtype=jnp.float32)
    y_res = jax.block_until_ready(_batch_resident_matmul(x2, wt2, tk2, tn2))
    y_3d = jax.block_until_ready(_grid3d_matmul(x2, wt2, B2, tk2, tn2))
    y2_ref = np.asarray(x2) @ np.asarray(wt2)
    _check(y_res, y2_ref, 2e-2, "demo C (batch-resident)")
    _check(y_3d, y2_ref, 2e-2, "demo C (3-D grid)")

    # ---- Demo D: general helper with non-aligned shapes (pads + slices).
    y_gen = jax.block_until_ready(pinv_apply(x2[:10, :384], wt2[:384, :320]))
    assert y_gen.shape == (10, 320)
    _check(y_gen, np.asarray(x2)[:10, :384] @ np.asarray(wt2)[:384, :320],
           2e-2, "demo D (general helper)")

    # TODO(synk): learnable pseudoinverse (learn=True training) is out of scope;
    # only the frozen forward pass is implemented.
    print("KERNEL_OK")
</pallas_src>

<mosaic_0001>
module attributes {stable_mosaic.version = 11 : i64} {
  func.func @_small_kernel(%arg0: memref<10x128xf32, #tpu.memory_space<vmem>>, %arg1: memref<128x256xf32, #tpu.memory_space<vmem>>, %arg2: memref<10x256xf32, #tpu.memory_space<vmem>>) attributes {dimension_semantics = [], scalar_prefetch = 0 : i64, scratch_operands = 0 : i64, tpu.core_type = #tpu.core_type<tc>} {
    %c0 = arith.constant 0 : index
    %c0_0 = arith.constant 0 : index
    %0 = vector.load %arg0[%c0, %c0_0] : memref<10x128xf32, #tpu.memory_space<vmem>>, vector<10x128xf32>
    %c0_1 = arith.constant 0 : index
    %c0_2 = arith.constant 0 : index
    %1 = vector.load %arg1[%c0_1, %c0_2] : memref<128x256xf32, #tpu.memory_space<vmem>>, vector<128x256xf32>
    %cst = arith.constant dense<0.000000e+00> : vector<10x256xf32>
    %2 = tpu.matmul %0, %1, %cst {dimension_numbers = #tpu.dot_dimension_numbers<[1], [0], [0], [1], [0, 0, 1, 1], [], []>} : vector<10x128xf32>, vector<128x256xf32>, vector<10x256xf32> -> vector<10x256xf32>
    %c0_3 = arith.constant 0 : index
    %c0_4 = arith.constant 0 : index
    %3 = vector.load %arg2[%c0_3, %c0_4] : memref<10x256xf32, #tpu.memory_space<vmem>>, vector<10x256xf32>
    tpu.vector_store %arg2[%c0_3, %c0_4], %2 {strides = array<i32>} : memref<10x256xf32, #tpu.memory_space<vmem>>, vector<10x256xf32>,
    return
  }
}

</mosaic_0001>

<bundles_post_ra>
// kernel: tpu_custom_call.1
= control target key start
LH: loop header
LB: loop body
LE: loop exit
PB: predicated region body
PF: predicated region fallthrough
CT: control target
= control target key end

     0   :  { %7 = vsyncpa [#allocation3], 0  ;;  %s302_s0 = inlined_call_operand.hbm [shape: f32[10,128], index: 0, kind: input, shape index: {}]   ;;  %s303_s1 = inlined_call_operand.hbm [shape: f32[128,256], index: 1, kind: input, shape index: {}]   ;;  %s304_s2 = inlined_call_operand.hbm [shape: f32[10,256], index: 2, kind: output, shape index: {}]  }
   0x1   :  { %8 = vsyncpa [#allocation6], 0 }
   0x2   :  { %9 = vsyncpa [#allocation4], 0  ;;  %s14_s11 = sshll.u32 %s302_s0, 4  ;;  %s265_s12 = smov [#allocation2]   ;;  %s15_s11 = int_to_ptr.hbm [resolvable:$true] %s14_s11 }
   0x3   :  { %s16_s13 = sshll.u32 %s265_s12, 4  ;;  %s27_s16 = sshll.u32 %s303_s1, 4  ;;  %s17_s13 = int_to_ptr.vmem [resolvable:$true] %s16_s13  ;;  %s28_s16 = int_to_ptr.hbm [resolvable:$true] %s27_s16 }
   0x4   :  { %s266_s17 = smov 128   ;;  %s267_s18 = smov 8  }
   0x5   :  { %22 = dma.hbm_to_vmem [thread:$0]  %s15_s11, 256, %s17_s13, [#allocation3], %s266_s17, %s266_s17, %s267_s18  }
   0x6   :  { %s268_s19 = smov [#allocation5]   ;;  %s269_s21 = smov 256  }
   0x7   :  { %s29_s20 = sshll.u32 %s268_s19, 4  ;;  %s270_s22 = smov 16   ;;  %s30_s20 = int_to_ptr.vmem [resolvable:$true] %s29_s20 }
   0x8   :  { %35 = dma.hbm_to_vmem [thread:$0]  %s28_s16, 4096, %s30_s20, [#allocation6], %s269_s21, %s269_s21, %s270_s22  }
   0x9   :  { %259 = dma.done.wait [#allocation3], 256  }
   0xa   :  { %260 = vsyncadd [#allocation3], 4294967040 }
   0xb   :  { %261 = dma.done.wait [#allocation6], 4096  }
   0xc   :  { %262 = vsyncadd [#allocation6], 4294963200  ;;  %v76_v0 = vld [vmem:[#allocation5 + $0xf0] sm:$0xff]  ;;  %v77_v1 = vld [vmem:[#allocation5 + $0xf8] sm:$0xff]  ;;  %s271_s0 = smov [#allocation7]   ;;  %s134_s25 = sshll.u32 %s304_s2, 4  ;;  %s135_s25 = int_to_ptr.hbm [resolvable:$true] %s134_s25 }
   0xd   :  { %v74_v2 = vld [vmem:[#allocation5 + $0xe0] sm:$0xff]  ;;  %148 = vmatpush.msra.mxu2 %v76_v0  ;;  %164 = vmatpush.msra.mxu3 %v77_v1  ;;  %v75_v3 = vld [vmem:[#allocation5 + $0xe8] sm:$0xff]  ;;  %v72_v4 = vld [vmem:[#allocation5 + $0xd0] sm:$0xff]  ;;  %s132_s1 = sshll.u32 %s271_s0, 4  ;;  %s133_s1 = int_to_ptr.vmem [resolvable:$true] %s132_s1 }
   0xe   :  { %v73_v5 = vld [vmem:[#allocation5 + $0xd8] sm:$0xff]  ;;  %78 = vmatpush.msra.mxu0 %v76_v0  ;;  %101 = vmatpush.msra.mxu1 %v77_v1  ;;  %v70_v6 = vld [vmem:[#allocation5 + $0xc0] sm:$0xff]  ;;  %v71_v7 = vld [vmem:[#allocation5 + $0xc8] sm:$0xff] }
   0xf   :  { %149 = vmatpush.msra.mxu2 %v74_v2  ;;  %165 = vmatpush.msra.mxu3 %v75_v3  ;;  %v68_v8 = vld [vmem:[#allocation5 + $0xb0] sm:$0xff]  ;;  %v69_v9 = vld [vmem:[#allocation5 + $0xb8] sm:$0xff]  ;;  %v66_v10 = vld [vmem:[#allocation5 + $0xa0] sm:$0xff] }
  0x10   :  { %79 = vmatpush.msra.mxu0 %v74_v2  ;;  %102 = vmatpush.msra.mxu1 %v75_v3  ;;  %v67_v11 = vld [vmem:[#allocation5 + $0xa8] sm:$0xff]  ;;  %v64_v12 = vld [vmem:[#allocation5 + $0x90] sm:$0xff]  ;;  %v65_v13 = vld [vmem:[#allocation5 + $0x98] sm:$0xff] }
  0x11   :  { %150 = vmatpush.msra.mxu2 %v72_v4  ;;  %166 = vmatpush.msra.mxu3 %v73_v5  ;;  %v62_v14 = vld [vmem:[#allocation5 + $0x80] sm:$0xff]  ;;  %v63_v15 = vld [vmem:[#allocation5 + $0x88] sm:$0xff]  ;;  %v60_v16 = vld [vmem:[#allocation5 + $0x70] sm:$0xff] }
  0x12   :  { %80 = vmatpush.msra.mxu0 %v72_v4  ;;  %103 = vmatpush.msra.mxu1 %v73_v5  ;;  %v61_v17 = vld [vmem:[#allocation5 + $0x78] sm:$0xff]  ;;  %v58_v18 = vld [vmem:[#allocation5 + $0x60] sm:$0xff]  ;;  %v59_v19 = vld [vmem:[#allocation5 + $0x68] sm:$0xff] }
  0x13   :  { %151 = vmatpush.msra.mxu2 %v70_v6  ;;  %167 = vmatpush.msra.mxu3 %v71_v7  ;;  %v56_v20 = vld [vmem:[#allocation5 + $0x50] sm:$0xff]  ;;  %v57_v21 = vld [vmem:[#allocation5 + $0x58] sm:$0xff]  ;;  %v54_v22 = vld [vmem:[#allocation5 + $0x40] sm:$0xff] }
  0x14   :  { %81 = vmatpush.msra.mxu0 %v70_v6  ;;  %104 = vmatpush.msra.mxu1 %v71_v7  ;;  %v55_v23 = vld [vmem:[#allocation5 + $0x48] sm:$0xff]  ;;  %v52_v24 = vld [vmem:[#allocation5 + $0x30] sm:$0xff]  ;;  %v53_v25 = vld [vmem:[#allocation5 + $0x38] sm:$0xff] }
  0x15   :  { %152 = vmatpush.msra.mxu2 %v68_v8  ;;  %168 = vmatpush.msra.mxu3 %v69_v9  ;;  %v50_v26 = vld [vmem:[#allocation5 + $0x20] sm:$0xff]  ;;  %v51_v27 = vld [vmem:[#allocation5 + $0x28] sm:$0xff]  ;;  %v48_v28 = vld [vmem:[#allocation5 + $0x10] sm:$0xff] }
  0x16   :  { %82 = vmatpush.msra.mxu0 %v68_v8  ;;  %105 = vmatpush.msra.mxu1 %v69_v9  ;;  %v49_v29 = vld [vmem:[#allocation5 + $0x18] sm:$0xff]  ;;  %v46_v30 = vld [vmem:[#allocation5] sm:$0xff]  ;;  %v47_v31 = vld [vmem:[#allocation5 + $0x8] sm:$0xff] }
  0x17   :  { %153 = vmatpush.msra.mxu2 %v66_v10  ;;  %169 = vmatpush.msra.mxu3 %v67_v11  ;;  %v45_v32 = vld [vmem:[#allocation2 + $0x8] sm:$0x3]  ;;  %v44_v33 = vld [vmem:[#allocation2] sm:$0xff] }
  0x18   :  { %83 = vmatpush.msra.mxu0 %v66_v10  ;;  %106 = vmatpush.msra.mxu1 %v67_v11 }
  0x19   :  { %154 = vmatpush.msra.mxu2 %v64_v12  ;;  %170 = vmatpush.msra.mxu3 %v65_v13 }
  0x1a   :  { %84 = vmatpush.msra.mxu0 %v64_v12  ;;  %107 = vmatpush.msra.mxu1 %v65_v13 }
  0x1b   :  { %155 = vmatpush.msra.mxu2 %v62_v14  ;;  %171 = vmatpush.msra.mxu3 %v63_v15 }
  0x1c   :  { %85 = vmatpush.msra.mxu0 %v62_v14  ;;  %108 = vmatpush.msra.mxu1 %v63_v15 }
  0x1d   :  { %156 = vmatpush.msra.mxu2 %v60_v16  ;;  %172 = vmatpush.msra.mxu3 %v61_v17 }
  0x1e   :  { %86 = vmatpush.msra.mxu0 %v60_v16  ;;  %109 = vmatpush.msra.mxu1 %v61_v17 }
  0x1f   :  { %157 = vmatpush.msra.mxu2 %v58_v18  ;;  %173 = vmatpush.msra.mxu3 %v59_v19 }
  0x20   :  { %87 = vmatpush.msra.mxu0 %v58_v18  ;;  %110 = vmatpush.msra.mxu1 %v59_v19 }
  0x21   :  { %158 = vmatpush.msra.mxu2 %v56_v20  ;;  %174 = vmatpush.msra.mxu3 %v57_v21 }
  0x22   :  { %88 = vmatpush.msra.mxu0 %v56_v20  ;;  %111 = vmatpush.msra.mxu1 %v57_v21 }
  0x23   :  { %159 = vmatpush.msra.mxu2 %v54_v22  ;;  %175 = vmatpush.msra.mxu3 %v55_v23 }
  0x24   :  { %89 = vmatpush.msra.mxu0 %v54_v22  ;;  %112 = vmatpush.msra.mxu1 %v55_v23 }
  0x25   :  { %160 = vmatpush.msra.mxu2 %v52_v24  ;;  %176 = vmatpush.msra.mxu3 %v53_v25 }
  0x26   :  { %90 = vmatpush.msra.mxu0 %v52_v24  ;;  %113 = vmatpush.msra.mxu1 %v53_v25 }
  0x27   :  { %161 = vmatpush.msra.mxu2 %v50_v26  ;;  %177 = vmatpush.msra.mxu3 %v51_v27 }
  0x28   :  { %91 = vmatpush.msra.mxu0 %v50_v26  ;;  %114 = vmatpush.msra.mxu1 %v51_v27 }
  0x29   :  { %162 = vmatpush.msra.mxu2 %v48_v28  ;;  %178 = vmatpush.msra.mxu3 %v49_v29 }
  0x2a   :  { %92 = vmatpush.msra.mxu0 %v48_v28  ;;  %115 = vmatpush.msra.mxu1 %v49_v29 }
  0x2b   :  { %163 = vmatpush.msra.mxu2 %v46_v30  ;;  %179 = vmatpush.msra.mxu3 %v47_v31 }
  0x2c   :  { %97 = vmatmul.f32.vlgmr.msra.gmra.mxu2 %v45_v32  ;;  %120 = vmatmul.f32.vlgmr.msra.gmra.mxu3 %v45_v32 }
  0x2d   :  { %93 = vmatpush.msra.mxu0 %v46_v30  ;;  %116 = vmatpush.msra.mxu1 %v47_v31 }
  0x2e   :  { %94 = vmatmul.f32.vlgmr.msra.gmra.mxu0 %v44_v33  ;;  %117 = vmatmul.f32.vlgmr.msra.gmra.mxu1 %v44_v33 }
  0xab   :  { %v95_v34 = vpop.f32.mrf.mxu0  ;;  %v118_v35 = vpop.f32.mrf.mxu1 }
  0xac   :  { %124 = vst [vmem:[#allocation7] sm:$0xff] %v95_v34 }
  0xad   :  { %125 = vst [vmem:[#allocation7 + $0x8] sm:$0xff] %v118_v35 }
  0xaf   :  { %v98_v36 = vpop.f32.mrf.mxu2  ;;  %v121_v37 = vpop.f32.mrf.mxu3 }
  0xb0   :  { %126 = vst [vmem:[#allocation7 + $0x10] sm:$0x3] %v98_v36 }
  0xb1   :  { %127 = vst [vmem:[#allocation7 + $0x18] sm:$0x3] %v121_v37 }
  0xb2   :  { %140 = dma.vmem_to_hbm [thread:$0]  %s133_s1, 512, %s135_s25, [#allocation4], %s269_s21, %s269_s21, %s270_s22  }
  0xb3   :  { %263 = dma.done.wait [#allocation4], 512  }
  0xb4   :  { %264 = vsyncadd [#allocation4], 4294966784 }
  0xb5   :  { %145 = vsyncpa [#allocation3], 1 }
  0xb6   :  { %146 = vsyncpa [#allocation6], 1 }
  0xb7   :  { %147 = vsyncpa [#allocation4], 1 }

</bundles_post_ra>
